<compile_context>
chip_gen: v5e
topology: v5e:2x2
jax: 0.10.0
libtpu: 0.0.40
codegen_flags: <defaults>
</compile_context>

<pallas_src>
import math

import jax
import jax.numpy as jnp
from jax.experimental import pallas as pl
from jax.experimental.pallas import tpu as pltpu


_LANE = 128
_SM_MAX = 64  # 64 * 128 = 8192 batch rows per grid step (~320 KiB x tile)


def _round_up(x, m):
    return ((x + m - 1) // m) * m


# ----------------------------------------------------------------------------
# Fused MLP kernel: yT = w2^T @ relu(w1^T @ xT + b1) + b2, batch lane-dense.
# ----------------------------------------------------------------------------
def _simplenet_kernel(x_ref, w1_ref, b1_ref, w2_ref, b2_ref, o_ref):
    # x_ref: (K, sm, 128) VMEM   o_ref: (N, sm, 128) VMEM
    # w1_ref: (K, H) SMEM  b1_ref: (H,) SMEM  w2_ref: (H, N) SMEM  b2_ref: (N,)
    K, sm, _ = x_ref.shape
    H = w1_ref.shape[1]
    N = w2_ref.shape[1]

    # Hoist all 80 scalar weight/bias reads out of the batch-chunk loop.
    w1 = [[w1_ref[k, j] for j in range(H)] for k in range(K)]
    b1 = [b1_ref[j] for j in range(H)]
    w2 = [[w2_ref[j, n] for n in range(N)] for j in range(H)]
    b2 = [b2_ref[n] for n in range(N)]

    # Process the tile in (<=8 sublane, 128 lane) = one-vreg batch chunks to
    # keep register pressure low.  Everything below is dense VPU FMAs; the
    # MXU is never touched.
    for off in range(0, sm, 8):
        cs = min(8, sm - off)
        xs = [x_ref[k, pl.ds(off, cs), :] for k in range(K)]      # K x (cs,128)

        hs = []
        for j in range(H):                                         # fc1 + ReLU
            acc = xs[0] * w1[0][j]
            for k in range(1, K):
                acc = acc + xs[k] * w1[k][j]
            hs.append(jnp.maximum(acc + b1[j], 0.0))

        for n in range(N):                                         # fc2
            acc = hs[0] * w2[0][n]
            for j in range(1, H):
                acc = acc + hs[j] * w2[j][n]
            o_ref[n, pl.ds(off, cs), :] = acc + b2[n]


# ----------------------------------------------------------------------------
# Wrapper
# ----------------------------------------------------------------------------
def simplenet_forward(x, params):
    """x: [B, 10] float32 -> [B, 2] float32 (matches SimpleNet.forward)."""
    x = x.astype(jnp.float32)
    M, K = x.shape
    w1 = params["w_fc1"].astype(jnp.float32)   # [10, 6]  stored as [in, out]
    b1 = params["b_fc1"].astype(jnp.float32)   # [6]
    w2 = params["w_fc2"].astype(jnp.float32)   # [6, 2]
    b2 = params["b_fc2"].astype(jnp.float32)   # [2]
    H, N = w1.shape[1], w2.shape[1]

    # Lane-dense layout: batch on (sublane-group, lane).  Callers streaming
    # large batches should produce x directly in [10, B] / [10, Bs, 128] form
    # to skip this transpose pass entirely.
    Bp = _round_up(M, _LANE)
    xT = jnp.transpose(x)                                  # (K, M)
    if Bp != M:
        xT = jnp.pad(xT, ((0, 0), (0, Bp - M)))            # <=127 cols, fuses
    Bs = Bp // _LANE
    x3 = xT.reshape(K, Bs, _LANE)

    # Batch tile: large enough to amortize per-step overhead; >=2 grid steps
    # when the batch allows so v7x's two TensorCores both get "parallel" work.
    if Bs <= 8:
        sm = Bs
    elif Bs <= 2 * _SM_MAX:
        sm = _round_up(pl.cdiv(Bs, 2), 8)
    else:
        sm = _SM_MAX
    grid = (pl.cdiv(Bs, sm),)

    y3 = pl.pallas_call(
        _simplenet_kernel,
        out_shape=jax.ShapeDtypeStruct((N, Bs, _LANE), jnp.float32),
        grid=grid,
        in_specs=[
            pl.BlockSpec((K, sm, _LANE), lambda i: (0, i, 0)),     # x (streamed)
            pl.BlockSpec(memory_space=pltpu.MemorySpace.SMEM),     # w1 scalars
            pl.BlockSpec(memory_space=pltpu.MemorySpace.SMEM),     # b1
            pl.BlockSpec(memory_space=pltpu.MemorySpace.SMEM),     # w2
            pl.BlockSpec(memory_space=pltpu.MemorySpace.SMEM),     # b2
        ],
        out_specs=pl.BlockSpec((N, sm, _LANE), lambda i: (0, i, 0)),
        compiler_params=pltpu.CompilerParams(
            dimension_semantics=("parallel",)),
    )(x3, w1, b1, w2, b2)

    # (N, Bs, 128) -> (B, N): tiny 8 B/row epilogue, negligible vs. x traffic.
    return jnp.transpose(y3.reshape(N, Bp)[:, :M])


# ----------------------------------------------------------------------------
# Parameters (deterministic, torch-default-style uniform init, stored [in,out])
# NOTE: PyTorch Linear stores weights as (out, in); real checkpoints must be
# transposed into the [in, out] layout used here.
# ----------------------------------------------------------------------------
def init_params(key):
    ks = jax.random.split(key, 4)

    def u(k, shape, fan_in):
        lim = 1.0 / math.sqrt(fan_in)
        return jax.random.uniform(k, shape, jnp.float32, -lim, lim)

    return {
        "w_fc1": u(ks[0], (10, 6), 10),
        "b_fc1": u(ks[1], (6,), 10),
        "w_fc2": u(ks[2], (6, 2), 6),
        "b_fc2": u(ks[3], (2,), 6),
    }


# ----------------------------------------------------------------------------
# Pure-JAX reference (exact f32 matmuls) for correctness checking
# ----------------------------------------------------------------------------
def simplenet_ref(x, params):
    hp = jax.lax.Precision.HIGHEST
    h = jnp.maximum(
        jnp.dot(x, params["w_fc1"], precision=hp) + params["b_fc1"], 0.0)
    return jnp.dot(h, params["w_fc2"], precision=hp) + params["b_fc2"]


if __name__ == "__main__":
    key = jax.random.PRNGKey(0)
    k_x, k_p, k_x2 = jax.random.split(key, 3)
    params = init_params(k_p)

    # Small batch consistent with SimpleNet.forward ([..., 10]).
    x = jax.random.normal(k_x, (8, 10), dtype=jnp.float32)
    out = jax.block_until_ready(simplenet_forward(x, params))
    assert out.shape == (8, 2), out.shape
    assert out.dtype == jnp.float32
    assert bool(jnp.all(jnp.isfinite(out)))
    ref = simplenet_ref(x, params)
    assert bool(jnp.allclose(out, ref, atol=1e-5, rtol=1e-5)), (
        "mismatch vs. pure-JAX reference (small batch)")

    # Ragged, multi-block batch to exercise the cdiv grid + masked last block.
    x2 = jax.random.normal(k_x2, (1283, 10), dtype=jnp.float32)
    out2 = jax.block_until_ready(simplenet_forward(x2, params))
    ref2 = simplenet_ref(x2, params)
    assert out2.shape == (1283, 2)
    assert bool(jnp.allclose(out2, ref2, atol=1e-5, rtol=1e-5)), (
        "mismatch vs. pure-JAX reference (ragged batch)")

    print("KERNEL_OK")
</pallas_src>

<mosaic_0001>
module attributes {stable_mosaic.version = 11 : i64} {
  func.func @_simplenet_kernel(%arg0: i32, %arg1: memref<10x1x128xf32, #tpu.memory_space<vmem>>, %arg2: memref<10x6xf32, #tpu.memory_space<smem>>, %arg3: memref<6xf32, #tpu.memory_space<smem>>, %arg4: memref<6x2xf32, #tpu.memory_space<smem>>, %arg5: memref<2xf32, #tpu.memory_space<smem>>, %arg6: memref<2x1x128xf32, #tpu.memory_space<vmem>>) attributes {dimension_semantics = [#tpu.dimension_semantics<parallel>], iteration_bounds = array<i64: 1>, scalar_prefetch = 0 : i64, scratch_operands = 0 : i64, tpu.core_type = #tpu.core_type<tc>, window_params = [{transform_indices = @transform_0, window_bounds = array<i64: 10, 1, 128>}, {transform_indices = @transform_1, window_bounds = array<i64: 10, 6>}, {transform_indices = @transform_2, window_bounds = array<i64: 6>}, {transform_indices = @transform_3, window_bounds = array<i64: 6, 2>}, {transform_indices = @transform_4, window_bounds = array<i64: 2>}, {transform_indices = @transform_5, window_bounds = array<i64: 2, 1, 128>}]} {
    %c0 = arith.constant 0 : index
    %c0_0 = arith.constant 0 : index
    %0 = memref.load %arg2[%c0, %c0_0] : memref<10x6xf32, #tpu.memory_space<smem>>
    %c0_1 = arith.constant 0 : index
    %c1 = arith.constant 1 : index
    %1 = memref.load %arg2[%c0_1, %c1] : memref<10x6xf32, #tpu.memory_space<smem>>
    %c0_2 = arith.constant 0 : index
    %c2 = arith.constant 2 : index
    %2 = memref.load %arg2[%c0_2, %c2] : memref<10x6xf32, #tpu.memory_space<smem>>
    %c0_3 = arith.constant 0 : index
    %c3 = arith.constant 3 : index
    %3 = memref.load %arg2[%c0_3, %c3] : memref<10x6xf32, #tpu.memory_space<smem>>
    %c0_4 = arith.constant 0 : index
    %c4 = arith.constant 4 : index
    %4 = memref.load %arg2[%c0_4, %c4] : memref<10x6xf32, #tpu.memory_space<smem>>
    %c0_5 = arith.constant 0 : index
    %c5 = arith.constant 5 : index
    %5 = memref.load %arg2[%c0_5, %c5] : memref<10x6xf32, #tpu.memory_space<smem>>
    %c1_6 = arith.constant 1 : index
    %c0_7 = arith.constant 0 : index
    %6 = memref.load %arg2[%c1_6, %c0_7] : memref<10x6xf32, #tpu.memory_space<smem>>
    %c1_8 = arith.constant 1 : index
    %c1_9 = arith.constant 1 : index
    %7 = memref.load %arg2[%c1_8, %c1_9] : memref<10x6xf32, #tpu.memory_space<smem>>
    %c1_10 = arith.constant 1 : index
    %c2_11 = arith.constant 2 : index
    %8 = memref.load %arg2[%c1_10, %c2_11] : memref<10x6xf32, #tpu.memory_space<smem>>
    %c1_12 = arith.constant 1 : index
    %c3_13 = arith.constant 3 : index
    %9 = memref.load %arg2[%c1_12, %c3_13] : memref<10x6xf32, #tpu.memory_space<smem>>
    %c1_14 = arith.constant 1 : index
    %c4_15 = arith.constant 4 : index
    %10 = memref.load %arg2[%c1_14, %c4_15] : memref<10x6xf32, #tpu.memory_space<smem>>
    %c1_16 = arith.constant 1 : index
    %c5_17 = arith.constant 5 : index
    %11 = memref.load %arg2[%c1_16, %c5_17] : memref<10x6xf32, #tpu.memory_space<smem>>
    %c2_18 = arith.constant 2 : index
    %c0_19 = arith.constant 0 : index
    %12 = memref.load %arg2[%c2_18, %c0_19] : memref<10x6xf32, #tpu.memory_space<smem>>
    %c2_20 = arith.constant 2 : index
    %c1_21 = arith.constant 1 : index
    %13 = memref.load %arg2[%c2_20, %c1_21] : memref<10x6xf32, #tpu.memory_space<smem>>
    %c2_22 = arith.constant 2 : index
    %c2_23 = arith.constant 2 : index
    %14 = memref.load %arg2[%c2_22, %c2_23] : memref<10x6xf32, #tpu.memory_space<smem>>
    %c2_24 = arith.constant 2 : index
    %c3_25 = arith.constant 3 : index
    %15 = memref.load %arg2[%c2_24, %c3_25] : memref<10x6xf32, #tpu.memory_space<smem>>
    %c2_26 = arith.constant 2 : index
    %c4_27 = arith.constant 4 : index
    %16 = memref.load %arg2[%c2_26, %c4_27] : memref<10x6xf32, #tpu.memory_space<smem>>
    %c2_28 = arith.constant 2 : index
    %c5_29 = arith.constant 5 : index
    %17 = memref.load %arg2[%c2_28, %c5_29] : memref<10x6xf32, #tpu.memory_space<smem>>
    %c3_30 = arith.constant 3 : index
    %c0_31 = arith.constant 0 : index
    %18 = memref.load %arg2[%c3_30, %c0_31] : memref<10x6xf32, #tpu.memory_space<smem>>
    %c3_32 = arith.constant 3 : index
    %c1_33 = arith.constant 1 : index
    %19 = memref.load %arg2[%c3_32, %c1_33] : memref<10x6xf32, #tpu.memory_space<smem>>
    %c3_34 = arith.constant 3 : index
    %c2_35 = arith.constant 2 : index
    %20 = memref.load %arg2[%c3_34, %c2_35] : memref<10x6xf32, #tpu.memory_space<smem>>
    %c3_36 = arith.constant 3 : index
    %c3_37 = arith.constant 3 : index
    %21 = memref.load %arg2[%c3_36, %c3_37] : memref<10x6xf32, #tpu.memory_space<smem>>
    %c3_38 = arith.constant 3 : index
    %c4_39 = arith.constant 4 : index
    %22 = memref.load %arg2[%c3_38, %c4_39] : memref<10x6xf32, #tpu.memory_space<smem>>
    %c3_40 = arith.constant 3 : index
    %c5_41 = arith.constant 5 : index
    %23 = memref.load %arg2[%c3_40, %c5_41] : memref<10x6xf32, #tpu.memory_space<smem>>
    %c4_42 = arith.constant 4 : index
    %c0_43 = arith.constant 0 : index
    %24 = memref.load %arg2[%c4_42, %c0_43] : memref<10x6xf32, #tpu.memory_space<smem>>
    %c4_44 = arith.constant 4 : index
    %c1_45 = arith.constant 1 : index
    %25 = memref.load %arg2[%c4_44, %c1_45] : memref<10x6xf32, #tpu.memory_space<smem>>
    %c4_46 = arith.constant 4 : index
    %c2_47 = arith.constant 2 : index
    %26 = memref.load %arg2[%c4_46, %c2_47] : memref<10x6xf32, #tpu.memory_space<smem>>
    %c4_48 = arith.constant 4 : index
    %c3_49 = arith.constant 3 : index
    %27 = memref.load %arg2[%c4_48, %c3_49] : memref<10x6xf32, #tpu.memory_space<smem>>
    %c4_50 = arith.constant 4 : index
    %c4_51 = arith.constant 4 : index
    %28 = memref.load %arg2[%c4_50, %c4_51] : memref<10x6xf32, #tpu.memory_space<smem>>
    %c4_52 = arith.constant 4 : index
    %c5_53 = arith.constant 5 : index
    %29 = memref.load %arg2[%c4_52, %c5_53] : memref<10x6xf32, #tpu.memory_space<smem>>
    %c5_54 = arith.constant 5 : index
    %c0_55 = arith.constant 0 : index
    %30 = memref.load %arg2[%c5_54, %c0_55] : memref<10x6xf32, #tpu.memory_space<smem>>
    %c5_56 = arith.constant 5 : index
    %c1_57 = arith.constant 1 : index
    %31 = memref.load %arg2[%c5_56, %c1_57] : memref<10x6xf32, #tpu.memory_space<smem>>
    %c5_58 = arith.constant 5 : index
    %c2_59 = arith.constant 2 : index
    %32 = memref.load %arg2[%c5_58, %c2_59] : memref<10x6xf32, #tpu.memory_space<smem>>
    %c5_60 = arith.constant 5 : index
    %c3_61 = arith.constant 3 : index
    %33 = memref.load %arg2[%c5_60, %c3_61] : memref<10x6xf32, #tpu.memory_space<smem>>
    %c5_62 = arith.constant 5 : index
    %c4_63 = arith.constant 4 : index
    %34 = memref.load %arg2[%c5_62, %c4_63] : memref<10x6xf32, #tpu.memory_space<smem>>
    %c5_64 = arith.constant 5 : index
    %c5_65 = arith.constant 5 : index
    %35 = memref.load %arg2[%c5_64, %c5_65] : memref<10x6xf32, #tpu.memory_space<smem>>
    %c6 = arith.constant 6 : index
    %c0_66 = arith.constant 0 : index
    %36 = memref.load %arg2[%c6, %c0_66] : memref<10x6xf32, #tpu.memory_space<smem>>
    %c6_67 = arith.constant 6 : index
    %c1_68 = arith.constant 1 : index
    %37 = memref.load %arg2[%c6_67, %c1_68] : memref<10x6xf32, #tpu.memory_space<smem>>
    %c6_69 = arith.constant 6 : index
    %c2_70 = arith.constant 2 : index
    %38 = memref.load %arg2[%c6_69, %c2_70] : memref<10x6xf32, #tpu.memory_space<smem>>
    %c6_71 = arith.constant 6 : index
    %c3_72 = arith.constant 3 : index
    %39 = memref.load %arg2[%c6_71, %c3_72] : memref<10x6xf32, #tpu.memory_space<smem>>
    %c6_73 = arith.constant 6 : index
    %c4_74 = arith.constant 4 : index
    %40 = memref.load %arg2[%c6_73, %c4_74] : memref<10x6xf32, #tpu.memory_space<smem>>
    %c6_75 = arith.constant 6 : index
    %c5_76 = arith.constant 5 : index
    %41 = memref.load %arg2[%c6_75, %c5_76] : memref<10x6xf32, #tpu.memory_space<smem>>
    %c7 = arith.constant 7 : index
    %c0_77 = arith.constant 0 : index
    %42 = memref.load %arg2[%c7, %c0_77] : memref<10x6xf32, #tpu.memory_space<smem>>
    %c7_78 = arith.constant 7 : index
    %c1_79 = arith.constant 1 : index
    %43 = memref.load %arg2[%c7_78, %c1_79] : memref<10x6xf32, #tpu.memory_space<smem>>
    %c7_80 = arith.constant 7 : index
    %c2_81 = arith.constant 2 : index
    %44 = memref.load %arg2[%c7_80, %c2_81] : memref<10x6xf32, #tpu.memory_space<smem>>
    %c7_82 = arith.constant 7 : index
    %c3_83 = arith.constant 3 : index
    %45 = memref.load %arg2[%c7_82, %c3_83] : memref<10x6xf32, #tpu.memory_space<smem>>
    %c7_84 = arith.constant 7 : index
    %c4_85 = arith.constant 4 : index
    %46 = memref.load %arg2[%c7_84, %c4_85] : memref<10x6xf32, #tpu.memory_space<smem>>
    %c7_86 = arith.constant 7 : index
    %c5_87 = arith.constant 5 : index
    %47 = memref.load %arg2[%c7_86, %c5_87] : memref<10x6xf32, #tpu.memory_space<smem>>
    %c8 = arith.constant 8 : index
    %c0_88 = arith.constant 0 : index
    %48 = memref.load %arg2[%c8, %c0_88] : memref<10x6xf32, #tpu.memory_space<smem>>
    %c8_89 = arith.constant 8 : index
    %c1_90 = arith.constant 1 : index
    %49 = memref.load %arg2[%c8_89, %c1_90] : memref<10x6xf32, #tpu.memory_space<smem>>
    %c8_91 = arith.constant 8 : index
    %c2_92 = arith.constant 2 : index
    %50 = memref.load %arg2[%c8_91, %c2_92] : memref<10x6xf32, #tpu.memory_space<smem>>
    %c8_93 = arith.constant 8 : index
    %c3_94 = arith.constant 3 : index
    %51 = memref.load %arg2[%c8_93, %c3_94] : memref<10x6xf32, #tpu.memory_space<smem>>
    %c8_95 = arith.constant 8 : index
    %c4_96 = arith.constant 4 : index
    %52 = memref.load %arg2[%c8_95, %c4_96] : memref<10x6xf32, #tpu.memory_space<smem>>
    %c8_97 = arith.constant 8 : index
    %c5_98 = arith.constant 5 : index
    %53 = memref.load %arg2[%c8_97, %c5_98] : memref<10x6xf32, #tpu.memory_space<smem>>
    %c9 = arith.constant 9 : index
    %c0_99 = arith.constant 0 : index
    %54 = memref.load %arg2[%c9, %c0_99] : memref<10x6xf32, #tpu.memory_space<smem>>
    %c9_100 = arith.constant 9 : index
    %c1_101 = arith.constant 1 : index
    %55 = memref.load %arg2[%c9_100, %c1_101] : memref<10x6xf32, #tpu.memory_space<smem>>
    %c9_102 = arith.constant 9 : index
    %c2_103 = arith.constant 2 : index
    %56 = memref.load %arg2[%c9_102, %c2_103] : memref<10x6xf32, #tpu.memory_space<smem>>
    %c9_104 = arith.constant 9 : index
    %c3_105 = arith.constant 3 : index
    %57 = memref.load %arg2[%c9_104, %c3_105] : memref<10x6xf32, #tpu.memory_space<smem>>
    %c9_106 = arith.constant 9 : index
    %c4_107 = arith.constant 4 : index
    %58 = memref.load %arg2[%c9_106, %c4_107] : memref<10x6xf32, #tpu.memory_space<smem>>
    %c9_108 = arith.constant 9 : index
    %c5_109 = arith.constant 5 : index
    %59 = memref.load %arg2[%c9_108, %c5_109] : memref<10x6xf32, #tpu.memory_space<smem>>
    %c0_110 = arith.constant 0 : index
    %60 = memref.load %arg3[%c0_110] : memref<6xf32, #tpu.memory_space<smem>>
    %c1_111 = arith.constant 1 : index
    %61 = memref.load %arg3[%c1_111] : memref<6xf32, #tpu.memory_space<smem>>
    %c2_112 = arith.constant 2 : index
    %62 = memref.load %arg3[%c2_112] : memref<6xf32, #tpu.memory_space<smem>>
    %c3_113 = arith.constant 3 : index
    %63 = memref.load %arg3[%c3_113] : memref<6xf32, #tpu.memory_space<smem>>
    %c4_114 = arith.constant 4 : index
    %64 = memref.load %arg3[%c4_114] : memref<6xf32, #tpu.memory_space<smem>>
    %c5_115 = arith.constant 5 : index
    %65 = memref.load %arg3[%c5_115] : memref<6xf32, #tpu.memory_space<smem>>
    %c0_116 = arith.constant 0 : index
    %c0_117 = arith.constant 0 : index
    %66 = memref.load %arg4[%c0_116, %c0_117] : memref<6x2xf32, #tpu.memory_space<smem>>
    %c0_118 = arith.constant 0 : index
    %c1_119 = arith.constant 1 : index
    %67 = memref.load %arg4[%c0_118, %c1_119] : memref<6x2xf32, #tpu.memory_space<smem>>
    %c1_120 = arith.constant 1 : index
    %c0_121 = arith.constant 0 : index
    %68 = memref.load %arg4[%c1_120, %c0_121] : memref<6x2xf32, #tpu.memory_space<smem>>
    %c1_122 = arith.constant 1 : index
    %c1_123 = arith.constant 1 : index
    %69 = memref.load %arg4[%c1_122, %c1_123] : memref<6x2xf32, #tpu.memory_space<smem>>
    %c2_124 = arith.constant 2 : index
    %c0_125 = arith.constant 0 : index
    %70 = memref.load %arg4[%c2_124, %c0_125] : memref<6x2xf32, #tpu.memory_space<smem>>
    %c2_126 = arith.constant 2 : index
    %c1_127 = arith.constant 1 : index
    %71 = memref.load %arg4[%c2_126, %c1_127] : memref<6x2xf32, #tpu.memory_space<smem>>
    %c3_128 = arith.constant 3 : index
    %c0_129 = arith.constant 0 : index
    %72 = memref.load %arg4[%c3_128, %c0_129] : memref<6x2xf32, #tpu.memory_space<smem>>
    %c3_130 = arith.constant 3 : index
    %c1_131 = arith.constant 1 : index
    %73 = memref.load %arg4[%c3_130, %c1_131] : memref<6x2xf32, #tpu.memory_space<smem>>
    %c4_132 = arith.constant 4 : index
    %c0_133 = arith.constant 0 : index
    %74 = memref.load %arg4[%c4_132, %c0_133] : memref<6x2xf32, #tpu.memory_space<smem>>
    %c4_134 = arith.constant 4 : index
    %c1_135 = arith.constant 1 : index
    %75 = memref.load %arg4[%c4_134, %c1_135] : memref<6x2xf32, #tpu.memory_space<smem>>
    %c5_136 = arith.constant 5 : index
    %c0_137 = arith.constant 0 : index
    %76 = memref.load %arg4[%c5_136, %c0_137] : memref<6x2xf32, #tpu.memory_space<smem>>
    %c5_138 = arith.constant 5 : index
    %c1_139 = arith.constant 1 : index
    %77 = memref.load %arg4[%c5_138, %c1_139] : memref<6x2xf32, #tpu.memory_space<smem>>
    %c0_140 = arith.constant 0 : index
    %78 = memref.load %arg5[%c0_140] : memref<2xf32, #tpu.memory_space<smem>>
    %c1_141 = arith.constant 1 : index
    %79 = memref.load %arg5[%c1_141] : memref<2xf32, #tpu.memory_space<smem>>
    %c0_142 = arith.constant 0 : index
    %c0_143 = arith.constant 0 : index
    %c0_144 = arith.constant 0 : index
    %80 = vector.load %arg1[%c0_142, %c0_143, %c0_144] : memref<10x1x128xf32, #tpu.memory_space<vmem>>, vector<1x1x128xf32>
    %81 = vector.shape_cast %80 : vector<1x1x128xf32> to vector<1x128xf32>
    %c1_145 = arith.constant 1 : index
    %c0_146 = arith.constant 0 : index
    %c0_147 = arith.constant 0 : index
    %82 = vector.load %arg1[%c1_145, %c0_146, %c0_147] : memref<10x1x128xf32, #tpu.memory_space<vmem>>, vector<1x1x128xf32>
    %83 = vector.shape_cast %82 : vector<1x1x128xf32> to vector<1x128xf32>
    %c2_148 = arith.constant 2 : index
    %c0_149 = arith.constant 0 : index
    %c0_150 = arith.constant 0 : index
    %84 = vector.load %arg1[%c2_148, %c0_149, %c0_150] : memref<10x1x128xf32, #tpu.memory_space<vmem>>, vector<1x1x128xf32>
    %85 = vector.shape_cast %84 : vector<1x1x128xf32> to vector<1x128xf32>
    %c3_151 = arith.constant 3 : index
    %c0_152 = arith.constant 0 : index
    %c0_153 = arith.constant 0 : index
    %86 = vector.load %arg1[%c3_151, %c0_152, %c0_153] : memref<10x1x128xf32, #tpu.memory_space<vmem>>, vector<1x1x128xf32>
    %87 = vector.shape_cast %86 : vector<1x1x128xf32> to vector<1x128xf32>
    %c4_154 = arith.constant 4 : index
    %c0_155 = arith.constant 0 : index
    %c0_156 = arith.constant 0 : index
    %88 = vector.load %arg1[%c4_154, %c0_155, %c0_156] : memref<10x1x128xf32, #tpu.memory_space<vmem>>, vector<1x1x128xf32>
    %89 = vector.shape_cast %88 : vector<1x1x128xf32> to vector<1x128xf32>
    %c5_157 = arith.constant 5 : index
    %c0_158 = arith.constant 0 : index
    %c0_159 = arith.constant 0 : index
    %90 = vector.load %arg1[%c5_157, %c0_158, %c0_159] : memref<10x1x128xf32, #tpu.memory_space<vmem>>, vector<1x1x128xf32>
    %91 = vector.shape_cast %90 : vector<1x1x128xf32> to vector<1x128xf32>
    %c6_160 = arith.constant 6 : index
    %c0_161 = arith.constant 0 : index
    %c0_162 = arith.constant 0 : index
    %92 = vector.load %arg1[%c6_160, %c0_161, %c0_162] : memref<10x1x128xf32, #tpu.memory_space<vmem>>, vector<1x1x128xf32>
    %93 = vector.shape_cast %92 : vector<1x1x128xf32> to vector<1x128xf32>
    %c7_163 = arith.constant 7 : index
    %c0_164 = arith.constant 0 : index
    %c0_165 = arith.constant 0 : index
    %94 = vector.load %arg1[%c7_163, %c0_164, %c0_165] : memref<10x1x128xf32, #tpu.memory_space<vmem>>, vector<1x1x128xf32>
    %95 = vector.shape_cast %94 : vector<1x1x128xf32> to vector<1x128xf32>
    %c8_166 = arith.constant 8 : index
    %c0_167 = arith.constant 0 : index
    %c0_168 = arith.constant 0 : index
    %96 = vector.load %arg1[%c8_166, %c0_167, %c0_168] : memref<10x1x128xf32, #tpu.memory_space<vmem>>, vector<1x1x128xf32>
    %97 = vector.shape_cast %96 : vector<1x1x128xf32> to vector<1x128xf32>
    %c9_169 = arith.constant 9 : index
    %c0_170 = arith.constant 0 : index
    %c0_171 = arith.constant 0 : index
    %98 = vector.load %arg1[%c9_169, %c0_170, %c0_171] : memref<10x1x128xf32, #tpu.memory_space<vmem>>, vector<1x1x128xf32>
    %99 = vector.shape_cast %98 : vector<1x1x128xf32> to vector<1x128xf32>
    %100 = vector.broadcast %0 : f32 to vector<1x128xf32>
    %101 = arith.mulf %81, %100 : vector<1x128xf32>
    %102 = vector.broadcast %6 : f32 to vector<1x128xf32>
    %103 = arith.mulf %83, %102 : vector<1x128xf32>
    %104 = arith.addf %101, %103 : vector<1x128xf32>
    %105 = vector.broadcast %12 : f32 to vector<1x128xf32>
    %106 = arith.mulf %85, %105 : vector<1x128xf32>
    %107 = arith.addf %104, %106 : vector<1x128xf32>
    %108 = vector.broadcast %18 : f32 to vector<1x128xf32>
    %109 = arith.mulf %87, %108 : vector<1x128xf32>
    %110 = arith.addf %107, %109 : vector<1x128xf32>
    %111 = vector.broadcast %24 : f32 to vector<1x128xf32>
    %112 = arith.mulf %89, %111 : vector<1x128xf32>
    %113 = arith.addf %110, %112 : vector<1x128xf32>
    %114 = vector.broadcast %30 : f32 to vector<1x128xf32>
    %115 = arith.mulf %91, %114 : vector<1x128xf32>
    %116 = arith.addf %113, %115 : vector<1x128xf32>
    %117 = vector.broadcast %36 : f32 to vector<1x128xf32>
    %118 = arith.mulf %93, %117 : vector<1x128xf32>
    %119 = arith.addf %116, %118 : vector<1x128xf32>
    %120 = vector.broadcast %42 : f32 to vector<1x128xf32>
    %121 = arith.mulf %95, %120 : vector<1x128xf32>
    %122 = arith.addf %119, %121 : vector<1x128xf32>
    %123 = vector.broadcast %48 : f32 to vector<1x128xf32>
    %124 = arith.mulf %97, %123 : vector<1x128xf32>
    %125 = arith.addf %122, %124 : vector<1x128xf32>
    %126 = vector.broadcast %54 : f32 to vector<1x128xf32>
    %127 = arith.mulf %99, %126 : vector<1x128xf32>
    %128 = arith.addf %125, %127 : vector<1x128xf32>
    %129 = vector.broadcast %60 : f32 to vector<1x128xf32>
    %130 = arith.addf %128, %129 : vector<1x128xf32>
    %cst = arith.constant 0.000000e+00 : f32
    %131 = vector.broadcast %cst : f32 to vector<1x128xf32>
    %132 = arith.maximumf %130, %131 : vector<1x128xf32>
    %133 = vector.broadcast %1 : f32 to vector<1x128xf32>
    %134 = arith.mulf %81, %133 : vector<1x128xf32>
    %135 = vector.broadcast %7 : f32 to vector<1x128xf32>
    %136 = arith.mulf %83, %135 : vector<1x128xf32>
    %137 = arith.addf %134, %136 : vector<1x128xf32>
    %138 = vector.broadcast %13 : f32 to vector<1x128xf32>
    %139 = arith.mulf %85, %138 : vector<1x128xf32>
    %140 = arith.addf %137, %139 : vector<1x128xf32>
    %141 = vector.broadcast %19 : f32 to vector<1x128xf32>
    %142 = arith.mulf %87, %141 : vector<1x128xf32>
    %143 = arith.addf %140, %142 : vector<1x128xf32>
    %144 = vector.broadcast %25 : f32 to vector<1x128xf32>
    %145 = arith.mulf %89, %144 : vector<1x128xf32>
    %146 = arith.addf %143, %145 : vector<1x128xf32>
    %147 = vector.broadcast %31 : f32 to vector<1x128xf32>
    %148 = arith.mulf %91, %147 : vector<1x128xf32>
    %149 = arith.addf %146, %148 : vector<1x128xf32>
    %150 = vector.broadcast %37 : f32 to vector<1x128xf32>
    %151 = arith.mulf %93, %150 : vector<1x128xf32>
    %152 = arith.addf %149, %151 : vector<1x128xf32>
    %153 = vector.broadcast %43 : f32 to vector<1x128xf32>
    %154 = arith.mulf %95, %153 : vector<1x128xf32>
    %155 = arith.addf %152, %154 : vector<1x128xf32>
    %156 = vector.broadcast %49 : f32 to vector<1x128xf32>
    %157 = arith.mulf %97, %156 : vector<1x128xf32>
    %158 = arith.addf %155, %157 : vector<1x128xf32>
    %159 = vector.broadcast %55 : f32 to vector<1x128xf32>
    %160 = arith.mulf %99, %159 : vector<1x128xf32>
    %161 = arith.addf %158, %160 : vector<1x128xf32>
    %162 = vector.broadcast %61 : f32 to vector<1x128xf32>
    %163 = arith.addf %161, %162 : vector<1x128xf32>
    %cst_172 = arith.constant 0.000000e+00 : f32
    %164 = vector.broadcast %cst_172 : f32 to vector<1x128xf32>
    %165 = arith.maximumf %163, %164 : vector<1x128xf32>
    %166 = vector.broadcast %2 : f32 to vector<1x128xf32>
    %167 = arith.mulf %81, %166 : vector<1x128xf32>
    %168 = vector.broadcast %8 : f32 to vector<1x128xf32>
    %169 = arith.mulf %83, %168 : vector<1x128xf32>
    %170 = arith.addf %167, %169 : vector<1x128xf32>
    %171 = vector.broadcast %14 : f32 to vector<1x128xf32>
    %172 = arith.mulf %85, %171 : vector<1x128xf32>
    %173 = arith.addf %170, %172 : vector<1x128xf32>
    %174 = vector.broadcast %20 : f32 to vector<1x128xf32>
    %175 = arith.mulf %87, %174 : vector<1x128xf32>
    %176 = arith.addf %173, %175 : vector<1x128xf32>
    %177 = vector.broadcast %26 : f32 to vector<1x128xf32>
    %178 = arith.mulf %89, %177 : vector<1x128xf32>
    %179 = arith.addf %176, %178 : vector<1x128xf32>
    %180 = vector.broadcast %32 : f32 to vector<1x128xf32>
    %181 = arith.mulf %91, %180 : vector<1x128xf32>
    %182 = arith.addf %179, %181 : vector<1x128xf32>
    %183 = vector.broadcast %38 : f32 to vector<1x128xf32>
    %184 = arith.mulf %93, %183 : vector<1x128xf32>
    %185 = arith.addf %182, %184 : vector<1x128xf32>
    %186 = vector.broadcast %44 : f32 to vector<1x128xf32>
    %187 = arith.mulf %95, %186 : vector<1x128xf32>
    %188 = arith.addf %185, %187 : vector<1x128xf32>
    %189 = vector.broadcast %50 : f32 to vector<1x128xf32>
    %190 = arith.mulf %97, %189 : vector<1x128xf32>
    %191 = arith.addf %188, %190 : vector<1x128xf32>
    %192 = vector.broadcast %56 : f32 to vector<1x128xf32>
    %193 = arith.mulf %99, %192 : vector<1x128xf32>
    %194 = arith.addf %191, %193 : vector<1x128xf32>
    %195 = vector.broadcast %62 : f32 to vector<1x128xf32>
    %196 = arith.addf %194, %195 : vector<1x128xf32>
    %cst_173 = arith.constant 0.000000e+00 : f32
    %197 = vector.broadcast %cst_173 : f32 to vector<1x128xf32>
    %198 = arith.maximumf %196, %197 : vector<1x128xf32>
    %199 = vector.broadcast %3 : f32 to vector<1x128xf32>
    %200 = arith.mulf %81, %199 : vector<1x128xf32>
    %201 = vector.broadcast %9 : f32 to vector<1x128xf32>
    %202 = arith.mulf %83, %201 : vector<1x128xf32>
    %203 = arith.addf %200, %202 : vector<1x128xf32>
    %204 = vector.broadcast %15 : f32 to vector<1x128xf32>
    %205 = arith.mulf %85, %204 : vector<1x128xf32>
    %206 = arith.addf %203, %205 : vector<1x128xf32>
    %207 = vector.broadcast %21 : f32 to vector<1x128xf32>
    %208 = arith.mulf %87, %207 : vector<1x128xf32>
    %209 = arith.addf %206, %208 : vector<1x128xf32>
    %210 = vector.broadcast %27 : f32 to vector<1x128xf32>
    %211 = arith.mulf %89, %210 : vector<1x128xf32>
    %212 = arith.addf %209, %211 : vector<1x128xf32>
    %213 = vector.broadcast %33 : f32 to vector<1x128xf32>
    %214 = arith.mulf %91, %213 : vector<1x128xf32>
    %215 = arith.addf %212, %214 : vector<1x128xf32>
    %216 = vector.broadcast %39 : f32 to vector<1x128xf32>
    %217 = arith.mulf %93, %216 : vector<1x128xf32>
    %218 = arith.addf %215, %217 : vector<1x128xf32>
    %219 = vector.broadcast %45 : f32 to vector<1x128xf32>
    %220 = arith.mulf %95, %219 : vector<1x128xf32>
    %221 = arith.addf %218, %220 : vector<1x128xf32>
    %222 = vector.broadcast %51 : f32 to vector<1x128xf32>
    %223 = arith.mulf %97, %222 : vector<1x128xf32>
    %224 = arith.addf %221, %223 : vector<1x128xf32>
    %225 = vector.broadcast %57 : f32 to vector<1x128xf32>
    %226 = arith.mulf %99, %225 : vector<1x128xf32>
    %227 = arith.addf %224, %226 : vector<1x128xf32>
    %228 = vector.broadcast %63 : f32 to vector<1x128xf32>
    %229 = arith.addf %227, %228 : vector<1x128xf32>
    %cst_174 = arith.constant 0.000000e+00 : f32
    %230 = vector.broadcast %cst_174 : f32 to vector<1x128xf32>
    %231 = arith.maximumf %229, %230 : vector<1x128xf32>
    %232 = vector.broadcast %4 : f32 to vector<1x128xf32>
    %233 = arith.mulf %81, %232 : vector<1x128xf32>
    %234 = vector.broadcast %10 : f32 to vector<1x128xf32>
    %235 = arith.mulf %83, %234 : vector<1x128xf32>
    %236 = arith.addf %233, %235 : vector<1x128xf32>
    %237 = vector.broadcast %16 : f32 to vector<1x128xf32>
    %238 = arith.mulf %85, %237 : vector<1x128xf32>
    %239 = arith.addf %236, %238 : vector<1x128xf32>
    %240 = vector.broadcast %22 : f32 to vector<1x128xf32>
    %241 = arith.mulf %87, %240 : vector<1x128xf32>
    %242 = arith.addf %239, %241 : vector<1x128xf32>
    %243 = vector.broadcast %28 : f32 to vector<1x128xf32>
    %244 = arith.mulf %89, %243 : vector<1x128xf32>
    %245 = arith.addf %242, %244 : vector<1x128xf32>
    %246 = vector.broadcast %34 : f32 to vector<1x128xf32>
    %247 = arith.mulf %91, %246 : vector<1x128xf32>
    %248 = arith.addf %245, %247 : vector<1x128xf32>
    %249 = vector.broadcast %40 : f32 to vector<1x128xf32>
    %250 = arith.mulf %93, %249 : vector<1x128xf32>
    %251 = arith.addf %248, %250 : vector<1x128xf32>
    %252 = vector.broadcast %46 : f32 to vector<1x128xf32>
    %253 = arith.mulf %95, %252 : vector<1x128xf32>
    %254 = arith.addf %251, %253 : vector<1x128xf32>
    %255 = vector.broadcast %52 : f32 to vector<1x128xf32>
    %256 = arith.mulf %97, %255 : vector<1x128xf32>
    %257 = arith.addf %254, %256 : vector<1x128xf32>
    %258 = vector.broadcast %58 : f32 to vector<1x128xf32>
    %259 = arith.mulf %99, %258 : vector<1x128xf32>
    %260 = arith.addf %257, %259 : vector<1x128xf32>
    %261 = vector.broadcast %64 : f32 to vector<1x128xf32>
    %262 = arith.addf %260, %261 : vector<1x128xf32>
    %cst_175 = arith.constant 0.000000e+00 : f32
    %263 = vector.broadcast %cst_175 : f32 to vector<1x128xf32>
    %264 = arith.maximumf %262, %263 : vector<1x128xf32>
    %265 = vector.broadcast %5 : f32 to vector<1x128xf32>
    %266 = arith.mulf %81, %265 : vector<1x128xf32>
    %267 = vector.broadcast %11 : f32 to vector<1x128xf32>
    %268 = arith.mulf %83, %267 : vector<1x128xf32>
    %269 = arith.addf %266, %268 : vector<1x128xf32>
    %270 = vector.broadcast %17 : f32 to vector<1x128xf32>
    %271 = arith.mulf %85, %270 : vector<1x128xf32>
    %272 = arith.addf %269, %271 : vector<1x128xf32>
    %273 = vector.broadcast %23 : f32 to vector<1x128xf32>
    %274 = arith.mulf %87, %273 : vector<1x128xf32>
    %275 = arith.addf %272, %274 : vector<1x128xf32>
    %276 = vector.broadcast %29 : f32 to vector<1x128xf32>
    %277 = arith.mulf %89, %276 : vector<1x128xf32>
    %278 = arith.addf %275, %277 : vector<1x128xf32>
    %279 = vector.broadcast %35 : f32 to vector<1x128xf32>
    %280 = arith.mulf %91, %279 : vector<1x128xf32>
    %281 = arith.addf %278, %280 : vector<1x128xf32>
    %282 = vector.broadcast %41 : f32 to vector<1x128xf32>
    %283 = arith.mulf %93, %282 : vector<1x128xf32>
    %284 = arith.addf %281, %283 : vector<1x128xf32>
    %285 = vector.broadcast %47 : f32 to vector<1x128xf32>
    %286 = arith.mulf %95, %285 : vector<1x128xf32>
    %287 = arith.addf %284, %286 : vector<1x128xf32>
    %288 = vector.broadcast %53 : f32 to vector<1x128xf32>
    %289 = arith.mulf %97, %288 : vector<1x128xf32>
    %290 = arith.addf %287, %289 : vector<1x128xf32>
    %291 = vector.broadcast %59 : f32 to vector<1x128xf32>
    %292 = arith.mulf %99, %291 : vector<1x128xf32>
    %293 = arith.addf %290, %292 : vector<1x128xf32>
    %294 = vector.broadcast %65 : f32 to vector<1x128xf32>
    %295 = arith.addf %293, %294 : vector<1x128xf32>
    %cst_176 = arith.constant 0.000000e+00 : f32
    %296 = vector.broadcast %cst_176 : f32 to vector<1x128xf32>
    %297 = arith.maximumf %295, %296 : vector<1x128xf32>
    %298 = vector.broadcast %66 : f32 to vector<1x128xf32>
    %299 = arith.mulf %132, %298 : vector<1x128xf32>
    %300 = vector.broadcast %68 : f32 to vector<1x128xf32>
    %301 = arith.mulf %165, %300 : vector<1x128xf32>
    %302 = arith.addf %299, %301 : vector<1x128xf32>
    %303 = vector.broadcast %70 : f32 to vector<1x128xf32>
    %304 = arith.mulf %198, %303 : vector<1x128xf32>
    %305 = arith.addf %302, %304 : vector<1x128xf32>
    %306 = vector.broadcast %72 : f32 to vector<1x128xf32>
    %307 = arith.mulf %231, %306 : vector<1x128xf32>
    %308 = arith.addf %305, %307 : vector<1x128xf32>
    %309 = vector.broadcast %74 : f32 to vector<1x128xf32>
    %310 = arith.mulf %264, %309 : vector<1x128xf32>
    %311 = arith.addf %308, %310 : vector<1x128xf32>
    %312 = vector.broadcast %76 : f32 to vector<1x128xf32>
    %313 = arith.mulf %297, %312 : vector<1x128xf32>
    %314 = arith.addf %311, %313 : vector<1x128xf32>
    %315 = vector.broadcast %78 : f32 to vector<1x128xf32>
    %316 = arith.addf %314, %315 : vector<1x128xf32>
    %c0_177 = arith.constant 0 : index
    %c0_178 = arith.constant 0 : index
    %c0_179 = arith.constant 0 : index
    %317 = vector.load %arg6[%c0_177, %c0_178, %c0_179] : memref<2x1x128xf32, #tpu.memory_space<vmem>>, vector<1x1x128xf32>
    %318 = vector.shape_cast %317 : vector<1x1x128xf32> to vector<1x128xf32>
    %319 = vector.shape_cast %316 : vector<1x128xf32> to vector<1x1x128xf32>
    tpu.vector_store %arg6[%c0_177, %c0_178, %c0_179], %319 {strides = array<i32>} : memref<2x1x128xf32, #tpu.memory_space<vmem>>, vector<1x1x128xf32>,
    %320 = vector.broadcast %67 : f32 to vector<1x128xf32>
    %321 = arith.mulf %132, %320 : vector<1x128xf32>
    %322 = vector.broadcast %69 : f32 to vector<1x128xf32>
    %323 = arith.mulf %165, %322 : vector<1x128xf32>
    %324 = arith.addf %321, %323 : vector<1x128xf32>
    %325 = vector.broadcast %71 : f32 to vector<1x128xf32>
    %326 = arith.mulf %198, %325 : vector<1x128xf32>
    %327 = arith.addf %324, %326 : vector<1x128xf32>
    %328 = vector.broadcast %73 : f32 to vector<1x128xf32>
    %329 = arith.mulf %231, %328 : vector<1x128xf32>
    %330 = arith.addf %327, %329 : vector<1x128xf32>
    %331 = vector.broadcast %75 : f32 to vector<1x128xf32>
    %332 = arith.mulf %264, %331 : vector<1x128xf32>
    %333 = arith.addf %330, %332 : vector<1x128xf32>
    %334 = vector.broadcast %77 : f32 to vector<1x128xf32>
    %335 = arith.mulf %297, %334 : vector<1x128xf32>
    %336 = arith.addf %333, %335 : vector<1x128xf32>
    %337 = vector.broadcast %79 : f32 to vector<1x128xf32>
    %338 = arith.addf %336, %337 : vector<1x128xf32>
    %c1_180 = arith.constant 1 : index
    %c0_181 = arith.constant 0 : index
    %c0_182 = arith.constant 0 : index
    %339 = vector.load %arg6[%c1_180, %c0_181, %c0_182] : memref<2x1x128xf32, #tpu.memory_space<vmem>>, vector<1x1x128xf32>
    %340 = vector.shape_cast %339 : vector<1x1x128xf32> to vector<1x128xf32>
    %341 = vector.shape_cast %338 : vector<1x128xf32> to vector<1x1x128xf32>
    tpu.vector_store %arg6[%c1_180, %c0_181, %c0_182], %341 {strides = array<i32>} : memref<2x1x128xf32, #tpu.memory_space<vmem>>, vector<1x1x128xf32>,
    return
  }
  func.func @transform_0(%arg0: i32) -> (i32, i32, i32) {
    %c0_i32 = arith.constant 0 : i32
    %c0_i32_0 = arith.constant 0 : i32
    %c0_i32_1 = arith.constant 0 : i32
    return %c0_i32, %arg0, %c0_i32_0 : i32, i32, i32
  }
  func.func @transform_1(%arg0: i32) -> (i32, i32) {
    %c0_i32 = arith.constant 0 : i32
    %c0_i32_0 = arith.constant 0 : i32
    %c0_i32_1 = arith.constant 0 : i32
    return %c0_i32, %c0_i32_0 : i32, i32
  }
  func.func @transform_2(%arg0: i32) -> i32 {
    %c0_i32 = arith.constant 0 : i32
    %c0_i32_0 = arith.constant 0 : i32
    return %c0_i32 : i32
  }
  func.func @transform_3(%arg0: i32) -> (i32, i32) {
    %c0_i32 = arith.constant 0 : i32
    %c0_i32_0 = arith.constant 0 : i32
    %c0_i32_1 = arith.constant 0 : i32
    return %c0_i32, %c0_i32_0 : i32, i32
  }
  func.func @transform_4(%arg0: i32) -> i32 {
    %c0_i32 = arith.constant 0 : i32
    %c0_i32_0 = arith.constant 0 : i32
    return %c0_i32 : i32
  }
  func.func @transform_5(%arg0: i32) -> (i32, i32, i32) {
    %c0_i32 = arith.constant 0 : i32
    %c0_i32_0 = arith.constant 0 : i32
    %c0_i32_1 = arith.constant 0 : i32
    return %c0_i32, %arg0, %c0_i32_0 : i32, i32, i32
  }
}

</mosaic_0001>

<bundles_post_ra>
// kernel: tpu_custom_call.1
= control target key start
LH: loop header
LB: loop body
LE: loop exit
PB: predicated region body
PF: predicated region fallthrough
CT: control target
= control target key end

     0   :  { %10 = vsyncpa [#allocation4], 0  ;;  %s933_s0 = inlined_call_operand.vmem [shape: f32[10,1,128], index: 0, kind: input, shape index: {}]   ;;  %s934_s1 = inlined_call_operand.vmem [shape: f32[10,6], index: 1, kind: input, shape index: {}]   ;;  %s935_s2 = inlined_call_operand.vmem [shape: f32[6], index: 2, kind: input, shape index: {}]   ;;  %s936_s3 = inlined_call_operand.vmem [shape: f32[6,2], index: 3, kind: input, shape index: {}]   ;;  %s937_s4 = inlined_call_operand.vmem [shape: f32[2], index: 4, kind: input, shape index: {}]   ;;  %s938_s5 = inlined_call_operand.hbm [shape: f32[2,1,128], index: 5, kind: output, shape index: {}]  }
   0x1   :  { %11 = vsyncpa [#allocation6], 0 }
   0x2   :  { %12 = vsyncpa [#allocation9], 0  ;;  %s32_s20 = sshll.u32 %s935_s2, 4  ;;  %s33_s20 = int_to_ptr.vmem [resolvable:$true] %s32_s20 }
   0x3   :  { %13 = vsyncpa [#allocation3], 0  ;;  %s20_s23 = sshll.u32 %s934_s1, 4  ;;  %s598_s24 = smov [#allocation5]   ;;  %s21_s23 = int_to_ptr.vmem [resolvable:$true] %s20_s23 }
   0x4   :  { %35 = dma.vmem_to_smem %s33_s20, 16, %s598_s24, [#allocation6]  }
   0x5   :  { %s599_s25 = smov [#allocation2]   ;;  %s600_s26 = smov 128  }
   0x6   :  { %s601_s27 = smov 8   ;;  %s41_s30 = sshll.u32 %s936_s3, 4  ;;  %s42_s30 = int_to_ptr.vmem [resolvable:$true] %s41_s30 }
   0x7   :  { %26 = dma.vmem_to_smem %s21_s23, 256, %s599_s25, [#allocation4], %s600_s26, %s600_s26, %s601_s27  }
   0x8   :  { %s50_s7 = sshll.u32 %s937_s4, 4  ;;  %s602_s8 = smov [#allocation7]   ;;  %s51_s7 = int_to_ptr.vmem [resolvable:$true] %s50_s7 }
   0x9   :  { %44 = dma.vmem_to_smem %s42_s30, 128, %s602_s8, [#allocation6]  }
   0xa   :  { %s603_s1 = smov [#allocation8]  }
   0xb   :  { %53 = dma.vmem_to_smem %s51_s7, 16, %s603_s1, [#allocation9]  }
   0xc   :  { %590 = dma.done.wait [#allocation4], 256  }
   0xd   :  { %591 = vsyncadd [#allocation4], 4294967040 }
   0xe   :  { %592 = dma.done.wait [#allocation6], 144  }
   0xf   :  { %593 = vsyncadd [#allocation6], 4294967152 }
  0x10   :  { %594 = dma.done.wait [#allocation9], 16  }
  0x11   :  { %595 = vsyncadd [#allocation9], 4294967280 }
  0x12   :  { %70 = sfence }
  0x13   :  { %s71_s9 = sld [smem:[#allocation2]]  ;;  %v684_v0 = vld [vmem:[%s933_s0] sm:$0x1]  ;;  %v689_v1 = vld [vmem:[%s933_s0 + $0x1] sm:$0x1] }
  0x14   :  { %s649_s10 = sld [smem:[#allocation2 + $0x1]]  ;;  %v701_v8 = vld [vmem:[%s933_s0 + $0x2] sm:$0x1]  ;;  %v724_v22 = vld [vmem:[%s933_s0 + $0x3] sm:$0x1] }
  0x15   :  { %s651_s3 = sld [smem:[#allocation2 + $0x2]]  ;;  %v753_v41 = vld [vmem:[%s933_s0 + $0x4] sm:$0x1] }
  0x16   :  { %s653_s11 = sld [smem:[#allocation2 + $0x3]] }
  0x17   :  { %s655_s4 = sld [smem:[#allocation2 + $0x4]] }
  0x18   :  { %s657_s12 = sld [smem:[#allocation2 + $0x5]] }
  0x19   :  { %s429_s13 = sld [smem:[#allocation2 + $0x80]]  ;;  %v170_v2 = vstv %s71_s9 }
  0x1a   :  { %s430_s14 = sld [smem:[#allocation2 + $0x81]]  ;;  %v171_v4 = vmul.f32 %v170_v2, %v684_v0  ;;  %v202_v6 = vstv %s649_s10 }
  0x1b   :  { %s659_s15 = sld [smem:[#allocation2 + $0x82]]  ;;  %v203_v10 = vmul.f32 %v202_v6, %v684_v0  ;;  %v234_v14 = vstv %s651_s3 }
  0x1c   :  { %s661_s16 = sld [smem:[#allocation2 + $0x83]]  ;;  %v235_v16 = vmul.f32 %v234_v14, %v684_v0  ;;  %v266_v26 = vstv %s653_s11 }
  0x1d   :  { %s663_s17 = sld [smem:[#allocation2 + $0x84]]  ;;  %v267_v29 = vmul.f32 %v266_v26, %v684_v0  ;;  %v298_v39 = vstv %s655_s4 }
  0x1e   :  { %s665_s18 = sld [smem:[#allocation2 + $0x85]]  ;;  %v299_v47 = vmul.f32 %v298_v39, %v684_v0  ;;  %v330_v63 = vstv %s657_s12 }
  0x1f   :  { %s435_s19 = sld [smem:[#allocation2 + $0x100]]  ;;  %v172_v3 = vstv %s429_s13  ;;  %v331_v6 = vmul.f32 %v330_v63, %v684_v0 }
  0x20   :  { %s667_s20 = sld [smem:[#allocation2 + $0x101]]  ;;  %v173_v5 = vmul.f32 %v689_v1, %v172_v3  ;;  %v204_v7 = vstv %s430_s14 }
  0x21   :  { %s669_s21 = sld [smem:[#allocation2 + $0x102]]  ;;  %v205_v11 = vmul.f32 %v689_v1, %v204_v7  ;;  %v236_v17 = vstv %s659_s15  ;;  %v793_v7 = vld [vmem:[%s933_s0 + $0x5] sm:$0x1] }
  0x22   :  { %s671_s22 = sld [smem:[#allocation2 + $0x103]]  ;;  %v174_v13 = vadd.f32 %v173_v5, %v171_v4  ;;  %v237_v21 = vmul.f32 %v689_v1, %v236_v17  ;;  %v268_v31 = vstv %s661_s16 }
  0x23   :  { %s673_s23 = sld [smem:[#allocation2 + $0x104]]  ;;  %v206_v19 = vadd.f32 %v205_v11, %v203_v10  ;;  %v269_v36 = vmul.f32 %v689_v1, %v268_v31  ;;  %v300_v40 = vstv %s663_s17 }
  0x24   :  { %s675_s24 = sld [smem:[#allocation2 + $0x105]]  ;;  %v238_v27 = vadd.f32 %v237_v21, %v235_v16  ;;  %v301_v48 = vmul.f32 %v689_v1, %v300_v40 }
  0x25   :  { %s677_s25 = sld [smem:[#allocation2 + $0x180]]  ;;  %v175_v9 = vstv %s435_s19  ;;  %v270_v43 = vadd.f32 %v269_v36, %v267_v29 }
  0x26   :  { %s679_s26 = sld [smem:[#allocation2 + $0x181]]  ;;  %v207_v12 = vstv %s667_s20  ;;  %v176_v15 = vmul.f32 %v701_v8, %v175_v9  ;;  %v302_v55 = vadd.f32 %v301_v48, %v299_v47 }
  0x27   :  { %s691_s6 = sld [smem:[#allocation2 + $0x182]]  ;;  %v239_v18 = vstv %s669_s21  ;;  %v208_v20 = vmul.f32 %v701_v8, %v207_v12  ;;  %v332_v12 = vstv %s665_s18 }
  0x28   :  { %s696_s2 = sld [smem:[#allocation2 + $0x183]]  ;;  %v240_v25 = vmul.f32 %v701_v8, %v239_v18  ;;  %v177_v30 = vadd.f32 %v176_v15, %v174_v13  ;;  %v271_v32 = vstv %s671_s22  ;;  %v333_v15 = vmul.f32 %v689_v1, %v332_v12  ;;  %v817_v1 = vld [vmem:[%s933_s0 + $0x6] sm:$0x1] }
  0x29   :  { %s706_s1 = sld [smem:[#allocation2 + $0x184]]  ;;  %v209_v34 = vadd.f32 %v208_v20, %v206_v19  ;;  %v272_v44 = vmul.f32 %v701_v8, %v271_v32  ;;  %v303_v51 = vstv %s673_s23 }
  0x2a   :  { %s709_s9 = sld [smem:[#allocation2 + $0x185]]  ;;  %v241_v37 = vadd.f32 %v240_v25, %v238_v27  ;;  %v304_v59 = vmul.f32 %v701_v8, %v303_v51 }
  0x2b   :  { %s715_s10 = sld [smem:[#allocation2 + $0x200]]  ;;  %v178_v23 = vstv %s677_s25  ;;  %v273_v57 = vadd.f32 %v272_v44, %v270_v43  ;;  %v506_v44 = vld [vmem:[%s933_s0 + $0x7] sm:$0x1] }
  0x2c   :  { %s719_s13 = sld [smem:[#allocation2 + $0x201]]  ;;  %v210_v24 = vstv %s679_s26  ;;  %v179_v33 = vmul.f32 %v724_v22, %v178_v23  ;;  %v305_v2 = vadd.f32 %v304_v59, %v302_v55  ;;  %v334_v23 = vadd.f32 %v333_v15, %v331_v6 }
  0x2d   :  { %s730_s15 = sld [smem:[#allocation2 + $0x202]]  ;;  %v242_v28 = vstv %s691_s6  ;;  %v211_v35 = vmul.f32 %v724_v22, %v210_v24  ;;  %v335_v24 = vstv %s675_s24 }
  0x2e   :  { %s734_s19 = sld [smem:[#allocation2 + $0x203]]  ;;  %v243_v38 = vmul.f32 %v724_v22, %v242_v28  ;;  %v274_v46 = vstv %s696_s2  ;;  %v180_v49 = vadd.f32 %v179_v33, %v177_v30  ;;  %v336_v27 = vmul.f32 %v701_v8, %v335_v24  ;;  %v508_v24 = vld [vmem:[%s933_s0 + $0x9] sm:$0x1] }
  0x2f   :  { %s738_s20 = sld [smem:[#allocation2 + $0x204]]  ;;  %v212_v53 = vadd.f32 %v211_v35, %v209_v34  ;;  %v275_v58 = vmul.f32 %v724_v22, %v274_v46  ;;  %v306_v62 = vstv %s706_s1 }
  0x30   :  { %s743_s11 = sld [smem:[#allocation2 + $0x205]]  ;;  %v244_v54 = vadd.f32 %v243_v38, %v241_v37  ;;  %v307_v3 = vmul.f32 %v724_v22, %v306_v62  ;;  %v338_v28 = vstv %s709_s9  ;;  %v337_v8 = vadd.f32 %v336_v27, %v334_v23 }
  0x31   :  { %s748_s16 = sld [smem:[#allocation2 + $0x280]]  ;;  %v181_v42 = vstv %s715_s10  ;;  %v276_v10 = vadd.f32 %v275_v58, %v273_v57  ;;  %v339_v32 = vmul.f32 %v724_v22, %v338_v28 }
  0x32   :  { %s757_s25 = sld [smem:[#allocation2 + $0x281]]  ;;  %v213_v45 = vstv %s719_s13  ;;  %v182_v52 = vmul.f32 %v753_v41, %v181_v42  ;;  %v308_v18 = vadd.f32 %v307_v3, %v305_v2 }
  0x33   :  { %s763_s4 = sld [smem:[#allocation2 + $0x282]]  ;;  %v245_v50 = vstv %s730_s15  ;;  %v214_v56 = vmul.f32 %v753_v41, %v213_v45  ;;  %v340_v42 = vadd.f32 %v339_v32, %v337_v8 }
  0x34   :  { %s767_s17 = sld [smem:[#allocation2 + $0x283]]  ;;  %v246_v60 = vmul.f32 %v753_v41, %v245_v50  ;;  %v277_v61 = vstv %s734_s19  ;;  %v183_v4 = vadd.f32 %v182_v52, %v180_v49 }
  0x35   :  { %s770_s26 = sld [smem:[#allocation2 + $0x284]]  ;;  %v309_v5 = vstv %s738_s20  ;;  %v278_v11 = vmul.f32 %v753_v41, %v277_v61  ;;  %v215_v13 = vadd.f32 %v214_v56, %v212_v53  ;;  %v507_v61 = vld [vmem:[%s933_s0 + $0x8] sm:$0x1] }
  0x36   :  { %s775_s27 = sld [smem:[#allocation2 + $0x285]]  ;;  %v247_v0 = vadd.f32 %v246_v60, %v244_v54  ;;  %v310_v19 = vmul.f32 %v753_v41, %v309_v5  ;;  %v341_v35 = vstv %s743_s11 }
  0x37   :  { %s781_s23 = sld [smem:[#allocation2 + $0x300]]  ;;  %v184_v9 = vstv %s748_s16  ;;  %v279_v26 = vadd.f32 %v278_v11, %v276_v10  ;;  %v342_v43 = vmul.f32 %v753_v41, %v341_v35 }
  0x38   :  { %s784_s28 = sld [smem:[#allocation2 + $0x301]]  ;;  %v216_v14 = vstv %s757_s25  ;;  %v185_v20 = vmul.f32 %v793_v7, %v184_v9  ;;  %v311_v33 = vadd.f32 %v310_v19, %v308_v18  ;;  %s604_s25 = smov [#allocation10]  }
  0x39   :  { %s788_s29 = sld [smem:[#allocation2 + $0x302]]  ;;  %v248_v16 = vstv %s763_s4  ;;  %v217_v29 = vmul.f32 %v793_v7, %v216_v14  ;;  %v343_v58 = vadd.f32 %v342_v43, %v340_v42 }
  0x3a   :  { %s798_s12 = sld [smem:[#allocation2 + $0x303]]  ;;  %v280_v17 = vstv %s767_s17  ;;  %v249_v30 = vmul.f32 %v793_v7, %v248_v16  ;;  %v186_v36 = vadd.f32 %v185_v20, %v183_v4 }
  0x3b   :  { %s802_s2 = sld [smem:[#allocation2 + $0x304]]  ;;  %v312_v21 = vstv %s770_s26  ;;  %v281_v31 = vmul.f32 %v793_v7, %v280_v17  ;;  %v218_v45 = vadd.f32 %v217_v29, %v215_v13 }
  0x3c   :  { %s807_s7 = sld [smem:[#allocation2 + $0x305]]  ;;  %v313_v34 = vmul.f32 %v793_v7, %v312_v21  ;;  %v250_v46 = vadd.f32 %v249_v30, %v247_v0  ;;  %v344_v48 = vstv %s775_s27 }
  0x3d   :  { %s812_s18 = sld [smem:[#allocation2 + $0x380]]  ;;  %v187_v25 = vstv %s781_s23  ;;  %v282_v47 = vadd.f32 %v281_v31, %v279_v26  ;;  %v345_v59 = vmul.f32 %v793_v7, %v344_v48 }
  0x3e   :  { %s822_s10 = sld [smem:[#allocation2 + $0x381]]  ;;  %v188_v37 = vmul.f32 %v817_v1, %v187_v25  ;;  %v219_v38 = vstv %s784_s28  ;;  %v314_v41 = vadd.f32 %v313_v34, %v311_v33 }
  0x3f   :  { %s828_s24 = sld [smem:[#allocation2 + $0x382]]  ;;  %v251_v39 = vstv %s788_s29  ;;  %v220_v50 = vmul.f32 %v817_v1, %v219_v38  ;;  %v346_v11 = vadd.f32 %v345_v59, %v343_v58 }
  0x40   :  { %s832_s9 = sld [smem:[#allocation2 + $0x383]]  ;;  %v283_v40 = vstv %s798_s12  ;;  %v252_v51 = vmul.f32 %v817_v1, %v251_v39  ;;  %v189_v52 = vadd.f32 %v188_v37, %v186_v36 }
  0x41   :  { %s837_s13 = sld [smem:[#allocation2 + $0x384]]  ;;  %v315_v22 = vstv %s802_s2  ;;  %v284_v54 = vmul.f32 %v817_v1, %v283_v40  ;;  %v221_v62 = vadd.f32 %v220_v50, %v218_v45 }
  0x42   :  { %s842_s3 = sld [smem:[#allocation2 + $0x385]]  ;;  %v316_v55 = vmul.f32 %v817_v1, %v315_v22  ;;  %v347_v60 = vstv %s807_s7  ;;  %v253_v2 = vadd.f32 %v252_v51, %v250_v46 }
  0x43   :  { %s848_s19 = sld [smem:[#allocation2 + $0x400]]  ;;  %v190_v49 = vstv %s812_s18  ;;  %v285_v5 = vadd.f32 %v284_v54, %v282_v47  ;;  %v348_v12 = vmul.f32 %v817_v1, %v347_v60 }
  0x44   :  { %s853_s20 = sld [smem:[#allocation2 + $0x401]]  ;;  %v222_v53 = vstv %s822_s10  ;;  %v191_v56 = vmul.f32 %v506_v44, %v190_v49  ;;  %v317_v6 = vadd.f32 %v316_v55, %v314_v41 }
  0x45   :  { %s858_s11 = sld [smem:[#allocation2 + $0x402]]  ;;  %v254_v57 = vstv %s828_s24  ;;  %v223_v63 = vmul.f32 %v506_v44, %v222_v53  ;;  %v349_v25 = vadd.f32 %v348_v12, %v346_v11 }
  0x46   :  { %s862_s16 = sld [smem:[#allocation2 + $0x403]]  ;;  %v286_v3 = vstv %s832_s9  ;;  %v255_v4 = vmul.f32 %v506_v44, %v254_v57  ;;  %v192_v9 = vadd.f32 %v191_v56, %v189_v52 }
  0x47   :  { %s865_s21 = sld [smem:[#allocation2 + $0x404]]  ;;  %v318_v7 = vstv %s837_s13  ;;  %v287_v0 = vmul.f32 %v506_v44, %v286_v3  ;;  %v224_v16 = vadd.f32 %v223_v63, %v221_v62 }
  0x48   :  { %s871_s4 = sld [smem:[#allocation2 + $0x405]]  ;;  %v350_v15 = vstv %s842_s3  ;;  %v319_v19 = vmul.f32 %v506_v44, %v318_v7  ;;  %v256_v20 = vadd.f32 %v255_v4, %v253_v2 }
  0x49   :  { %s874_s17 = sld [smem:[#allocation2 + $0x480]]  ;;  %v193_v10 = vstv %s848_s19  ;;  %v351_v26 = vmul.f32 %v506_v44, %v350_v15  ;;  %v288_v28 = vadd.f32 %v287_v0, %v285_v5 }
  0x4a   :  { %s878_s26 = sld [smem:[#allocation2 + $0x481]]  ;;  %v194_v13 = vmul.f32 %v507_v61, %v193_v10  ;;  %v225_v14 = vstv %s853_s20  ;;  %v320_v33 = vadd.f32 %v319_v19, %v317_v6 }
  0x4b   :  { %s882_s27 = sld [smem:[#allocation2 + $0x482]]  ;;  %v226_v17 = vmul.f32 %v507_v61, %v225_v14  ;;  %v257_v18 = vstv %s858_s11  ;;  %v352_v39 = vadd.f32 %v351_v26, %v349_v25 }
  0x4c   :  { %s885_s23 = sld [smem:[#allocation2 + $0x483]]  ;;  %v258_v21 = vmul.f32 %v507_v61, %v257_v18  ;;  %v289_v23 = vstv %s862_s16  ;;  %v195_v27 = vadd.f32 %v194_v13, %v192_v9 }
  0x4d   :  { %s888_s28 = sld [smem:[#allocation2 + $0x484]]  ;;  %v321_v1 = vstv %s865_s21  ;;  %v290_v29 = vmul.f32 %v507_v61, %v289_v23  ;;  %v227_v32 = vadd.f32 %v226_v17, %v224_v16 }
  0x4e   :  { %s894_s6 = sld [smem:[#allocation2 + $0x485]]  ;;  %v353_v30 = vstv %s871_s4  ;;  %v259_v35 = vadd.f32 %v258_v21, %v256_v20  ;;  %v322_v36 = vmul.f32 %v507_v61, %v321_v1  ;;  %s407_s4 = sshll.u32 %s604_s25, 4  ;;  %s408_s4 = int_to_ptr.vmem [resolvable:$true] %s407_s4 }
  0x4f   :  { %s897_s12 = sld [smem:[#allocation5]]  ;;  %v196_v31 = vstv %s874_s17  ;;  %v354_v40 = vmul.f32 %v507_v61, %v353_v30  ;;  %v291_v43 = vadd.f32 %v290_v29, %v288_v28 }
  0x50   :  { %s900_s2 = sld [smem:[#allocation5 + $0x1]]  ;;  %v197_v34 = vmul.f32 %v508_v24, %v196_v31  ;;  %v228_v8 = vstv %s878_s26  ;;  %v323_v49 = vadd.f32 %v322_v36, %v320_v33 }
  0x51   :  { %s903_s0 = sld [smem:[#allocation5 + $0x2]]  ;;  %v229_v37 = vmul.f32 %v508_v24, %v228_v8  ;;  %v260_v38 = vstv %s882_s27  ;;  %v355_v52 = vadd.f32 %v354_v40, %v352_v39  ;;  %s409_s27 = sshll.u32 %s938_s5, 4  ;;  %s410_s27 = int_to_ptr.hbm [resolvable:$true] %s409_s27 }
  0x52   :  { %s906_s7 = sld [smem:[#allocation5 + $0x3]]  ;;  %v198_v22 = vadd.f32 %v197_v34, %v195_v27  ;;  %v261_v42 = vmul.f32 %v508_v24, %v260_v38  ;;  %v292_v44 = vstv %s885_s23  ;;  %s605_s23 = smov 16  }
  0x53   :  { %s909_s18 = sld [smem:[#allocation5 + $0x4]]  ;;  %v230_v45 = vadd.f32 %v229_v37, %v227_v32  ;;  %v293_v46 = vmul.f32 %v508_v24, %v292_v44  ;;  %v324_v47 = vstv %s888_s28  ;;  %s606_s28 = smov 1  }
  0x54   :  { %s912_s8 = sld [smem:[#allocation5 + $0x5]]  ;;  %v262_v48 = vadd.f32 %v261_v42, %v259_v35  ;;  %v325_v50 = vmul.f32 %v508_v24, %v324_v47  ;;  %v356_v51 = vstv %s894_s6 }
  0x55   :  { %s137_s1 = sld [smem:[#allocation7]]  ;;  %v199_v41 = vstv %s897_s12  ;;  %v294_v55 = vadd.f32 %v293_v46, %v291_v43  ;;  %v357_v56 = vmul.f32 %v508_v24, %v356_v51 }
  0x56   :  { %s488_s10 = sld [smem:[#allocation7 + $0x1]]  ;;  %v200_v53 = vadd.f32 %v199_v41, %v198_v22  ;;  %v231_v54 = vstv %s900_s2  ;;  %v326_v62 = vadd.f32 %v325_v50, %v323_v49 }
  0x57   :  { %s489_s24 = sld [smem:[#allocation7 + $0x80]]  ;;  %v232_v57 = vadd.f32 %v231_v54, %v230_v45  ;;  %v263_v58 = vstv %s903_s0  ;;  %v358_v4 = vadd.f32 %v357_v56, %v355_v52 }
  0x58   :  { %s490_s9 = sld [smem:[#allocation7 + $0x81]]  ;;  %v201_v59 = vmax.f32 %v200_v53, 0.0  ;;  %v264_v60 = vadd.f32 %v263_v58, %v262_v48  ;;  %v295_v61 = vstv %s906_s7 }
  0x59   :  { %s491_s13 = sld [smem:[#allocation7 + $0x100]]  ;;  %v327_v63 = vstv %s909_s18  ;;  %v233_v2 = vmax.f32 %v232_v57, 0.0  ;;  %v296_v3 = vadd.f32 %v295_v61, %v294_v55 }
  0x5a   :  { %s920_s3 = sld [smem:[#allocation7 + $0x101]]  ;;  %v359_v5 = vstv %s912_s8  ;;  %v265_v7 = vmax.f32 %v264_v60, 0.0  ;;  %v328_v9 = vadd.f32 %v327_v63, %v326_v62 }
  0x5b   :  { %s922_s14 = sld [smem:[#allocation7 + $0x180]]  ;;  %v362_v6 = vstv %s137_s1  ;;  %v297_v14 = vmax.f32 %v296_v3, 0.0  ;;  %v360_v0 = vadd.f32 %v359_v5, %v358_v4 }
  0x5c   :  { %s925_s15 = sld [smem:[#allocation7 + $0x181]]  ;;  %v363_v10 = vmul.f32 %v362_v6, %v201_v59  ;;  %v382_v11 = vstv %s488_s10  ;;  %v329_v19 = vmax.f32 %v328_v9, 0.0 }
  0x5d   :  { %s495_s19 = sld [smem:[#allocation7 + $0x200]]  ;;  %v364_v12 = vstv %s489_s24  ;;  %v383_v13 = vmul.f32 %v382_v11, %v201_v59  ;;  %v361_v26 = vmax.f32 %v360_v0, 0.0 }
  0x5e   :  { %s496_s20 = sld [smem:[#allocation7 + $0x201]]  ;;  %v365_v15 = vmul.f32 %v364_v12, %v233_v2  ;;  %v384_v16 = vstv %s490_s9 }
  0x5f   :  { %s497_s11 = sld [smem:[#allocation7 + $0x280]]  ;;  %v367_v17 = vstv %s491_s13  ;;  %v385_v18 = vmul.f32 %v384_v16, %v233_v2 }
  0x60   :  { %s498_s16 = sld [smem:[#allocation7 + $0x281]]  ;;  %v366_v20 = vadd.f32 %v365_v15, %v363_v10  ;;  %v368_v21 = vmul.f32 %v367_v17, %v265_v7  ;;  %v387_v23 = vstv %s920_s3 }
  0x61   :  { %s149_s21 = sld [smem:[#allocation8]]  ;;  %v370_v24 = vstv %s922_s14  ;;  %v386_v1 = vadd.f32 %v385_v18, %v383_v13  ;;  %v388_v25 = vmul.f32 %v387_v23, %v265_v7 }
  0x62   :  { %s499_s22 = sld [smem:[#allocation8 + $0x1]]  ;;  %v369_v27 = vadd.f32 %v368_v21, %v366_v20  ;;  %v371_v28 = vmul.f32 %v370_v24, %v297_v14  ;;  %v390_v29 = vstv %s925_s15 }
  0x63   :  { %v373_v30 = vstv %s495_s19  ;;  %v389_v31 = vadd.f32 %v388_v25, %v386_v1  ;;  %v391_v32 = vmul.f32 %v390_v29, %v297_v14 }
  0x64   :  { %v372_v33 = vadd.f32 %v371_v28, %v369_v27  ;;  %v374_v34 = vmul.f32 %v373_v30, %v329_v19  ;;  %v393_v8 = vstv %s496_s20 }
  0x65   :  { %v376_v35 = vstv %s497_s11  ;;  %v392_v36 = vadd.f32 %v391_v32, %v389_v31  ;;  %v394_v37 = vmul.f32 %v393_v8, %v329_v19 }
  0x66   :  { %v375_v38 = vadd.f32 %v374_v34, %v372_v33  ;;  %v377_v39 = vmul.f32 %v376_v35, %v361_v26  ;;  %v396_v40 = vstv %s498_s16 }
  0x67   :  { %v379_v22 = vstv %s149_s21  ;;  %v395_v42 = vadd.f32 %v394_v37, %v392_v36  ;;  %v397_v43 = vmul.f32 %v396_v40, %v361_v26 }
  0x68   :  { %v378_v44 = vadd.f32 %v377_v39, %v375_v38  ;;  %v399_v45 = vstv %s499_s22 }
  0x69   :  { %v398_v46 = vadd.f32 %v397_v43, %v395_v42 }
  0x6a   :  { %v380_v47 = vadd.f32 %v379_v22, %v378_v44 }
  0x6b   :  { %v400_v48 = vadd.f32 %v399_v45, %v398_v46 }
  0x6c   :  { %381 = vst [vmem:[#allocation10] sm:$0x1] %v380_v47 }
  0x6d   :  { %402 = vst [vmem:[#allocation10 + $0x1] sm:$0x1] %v400_v48 }
  0x6e   :  { %415 = dma.vmem_to_hbm [thread:$0]  %s408_s4, 32, %s410_s27, [#allocation3], %s605_s23, %s605_s23, %s606_s28  }
  0x6f   :  { %596 = dma.done.wait [#allocation3], 32  }
  0x70   :  { %597 = vsyncadd [#allocation3], 4294967264 }
  0x71   :  { %420 = vsyncpa [#allocation3], 1 }
  0x72   :  { %421 = vsyncpa [#allocation4], 1 }
  0x73   :  { %422 = vsyncpa [#allocation6], 1 }
  0x74   :  { %423 = vsyncpa [#allocation9], 1 }

</bundles_post_ra>
